<compile_context>
chip_gen: v6e
topology: v6e:2x2x1
jax: 0.10.0
libtpu: 0.0.40
codegen_flags: <defaults>
</compile_context>

<pallas_src>
from collections import namedtuple
from functools import partial

import jax
import jax.numpy as jnp
from jax.experimental import pallas as pl
from jax.experimental.pallas import tpu as pltpu

ReturnValue = namedtuple(
    'ReturnValue',
    ['energy', 'noise', 'noise_level', 'unit_repr', 'block_repr', 'graph_repr',
     'batch_id', 'block_id', 'loss', 'noise_loss', 'noise_level_loss', 'align_loss'])

# ----------------------------- model hyper-params -----------------------------
HIDDEN = 32                   # logical hidden size
HPAD = 128                    # lane-dense padded hidden size
N_CHANNEL = 1
NC3 = N_CHANNEL * 3
GLOBAL_BLOCK_ID = 0           # VOCAB.symbol_to_idx(VOCAB.GLB) stand-in
NUM_BLOCK_TYPE = 20           # len(VOCAB) stand-in
NUM_ATOM_TYPE = 12            # VOCAB.get_num_atom_type() stand-in
NUM_ATOM_POS = 8              # VOCAB.get_num_atom_pos() stand-in
SIGMA_BEGIN, SIGMA_END, N_NOISE_LEVEL = 10.0, 0.01, 50
STD = 10.0

ROW_ALIGN = 16                 # multiple of 8 (f32) and 16 (bf16 sublane packing)
MAX_TILE_ROWS = 2048           # big tiles amortize the ~0.35us/step overhead
VMEM_LIMIT = 32 * 1024 * 1024  # ~3-4x the real working set; safe on v7x's 64 MiB
STREAM_DTYPE = jnp.bfloat16    # big row streams (h0, unit, block_repr, cotangents)


def _round_up(x, m):
    return ((x + m - 1) // m) * m


def _row_tile(n):
    """Row tile: aligned to ROW_ALIGN, <= MAX_TILE_ROWS, >= 2 grid steps when possible,
    and minimal padding (<= ROW_ALIGN-1 rows per tile).  Idempotent under padding."""
    n = max(int(n), 2 * ROW_ALIGN)
    num = max(2, -(-n // MAX_TILE_ROWS))
    return _round_up(-(-n // num), ROW_ALIGN)


def _tiles(rows):
    tile = _row_tile(rows)
    assert rows % tile == 0, (rows, tile)
    return tile, rows // tile


def _row_spec(tile):
    return pl.BlockSpec((tile, HPAD), lambda i: (i, 0))


def _col_spec(tile):
    return pl.BlockSpec((tile, 1), lambda i: (i, 0))


def _resident(shape):
    # Constant block index -> DMA'd once, stays VMEM-resident across the row grid.
    return pl.BlockSpec(shape, lambda i: (0, 0))


def _compiler_params():
    return pltpu.CompilerParams(dimension_semantics=("parallel",),
                                vmem_limit_bytes=VMEM_LIMIT)


# ----------------------- Pallas kernels: encoder unit MLP ----------------------
# unit = SiLU( (H0 + dist2 * w_z) @ W + b );  dist2 streamed as a (tile,1) column.
def _encoder_fwd_kernel(h0_ref, d2_ref, wz_ref, w_ref, b_ref, out_ref):
    h0 = h0_ref[...].astype(jnp.float32)
    feat = h0 + d2_ref[...] * wz_ref[...]                       # (T,1)*(1,128) bcast
    pre = jnp.dot(feat, w_ref[...], preferred_element_type=jnp.float32) + b_ref[...]
    out_ref[...] = (pre * jax.nn.sigmoid(pre)).astype(out_ref.dtype)


def _encoder_bwd_kernel(h0_ref, d2_ref, g_ref, wz_ref, w_ref, wt_ref, b_ref, dd2_ref):
    h0 = h0_ref[...].astype(jnp.float32)
    wz = wz_ref[...]
    feat = h0 + d2_ref[...] * wz
    pre = jnp.dot(feat, w_ref[...], preferred_element_type=jnp.float32) + b_ref[...]
    sig = jax.nn.sigmoid(pre)
    dpre = g_ref[...].astype(jnp.float32) * (sig * (1.0 + pre * (1.0 - sig)))
    dfeat = jnp.dot(dpre, wt_ref[...], preferred_element_type=jnp.float32)
    dd2_ref[...] = jnp.sum(dfeat * wz, axis=-1, keepdims=True)  # (T,1) XLU reduce


def _encoder_fwd_pallas(h0p, d2p, wz, w, b):
    rows = h0p.shape[0]
    tile, grid = _tiles(rows)
    return pl.pallas_call(
        _encoder_fwd_kernel,
        out_shape=jax.ShapeDtypeStruct((rows, HPAD), STREAM_DTYPE),
        grid=(grid,),
        in_specs=[_row_spec(tile), _col_spec(tile),
                  _resident((1, HPAD)), _resident((HPAD, HPAD)), _resident((1, HPAD))],
        out_specs=_row_spec(tile),
        compiler_params=_compiler_params(),
    )(h0p, d2p, wz, w, b)


def _encoder_bwd_pallas(h0p, d2p, g, wz, w, wt, b):
    rows = h0p.shape[0]
    tile, grid = _tiles(rows)
    return pl.pallas_call(
        _encoder_bwd_kernel,
        out_shape=jax.ShapeDtypeStruct((rows, 1), jnp.float32),
        grid=(grid,),
        in_specs=[_row_spec(tile), _col_spec(tile), _row_spec(tile),
                  _resident((1, HPAD)), _resident((HPAD, HPAD)),
                  _resident((HPAD, HPAD)), _resident((1, HPAD))],
        out_specs=_col_spec(tile),
        compiler_params=_compiler_params(),
    )(h0p, d2p, g, wz, w, wt, b)


@jax.custom_vjp
def encoder_unit(h0p, d2p, wz, w, wt, b):
    return _encoder_fwd_pallas(h0p, d2p, wz, w, b)


def _enc_fwd(h0p, d2p, wz, w, wt, b):
    return _encoder_fwd_pallas(h0p, d2p, wz, w, b), (h0p, d2p, wz, w, wt, b)


def _enc_bwd(res, g):
    h0p, d2p, wz, w, wt, b = res
    dd2 = _encoder_bwd_pallas(h0p, d2p, g, wz, w, wt, b)    # hot path (Pallas)
    # TODO(synk): parameter / H0 cotangents are omitted (zeros) — the reference
    # forward only differentiates the energy w.r.t. coordinates; add them to the
    # Pallas bwd kernel if parameter training through this path is needed.
    z = jnp.zeros_like
    return z(h0p), dd2, z(wz), z(w), z(wt), z(b)


encoder_unit.defvjp(_enc_fwd, _enc_bwd)


# --------------------------- Pallas kernels: energy FFN ------------------------
# nn.Sequential(SiLU, Linear(H,H), SiLU, Linear(H,1,bias=False)) per block.
# Energy is stored as a narrow (tile,1) column; the final (H,1) projection is a
# VPU multiply + XLU lane reduce.
def _ffn_fwd_kernel(h_ref, w1_ref, b1_ref, w2_ref, e_ref):
    h = h_ref[...].astype(jnp.float32)
    x0 = h * jax.nn.sigmoid(h)
    x1 = jnp.dot(x0, w1_ref[...], preferred_element_type=jnp.float32) + b1_ref[...]
    x2 = x1 * jax.nn.sigmoid(x1)
    e_ref[...] = jnp.sum(x2 * w2_ref[...], axis=-1, keepdims=True)   # (T,1)


def _ffn_bwd_kernel(h_ref, g_ref, w1_ref, b1_ref, w2_ref, w1t_ref, dh_ref):
    h = h_ref[...].astype(jnp.float32)
    sig_h = jax.nn.sigmoid(h)
    x0 = h * sig_h
    x1 = jnp.dot(x0, w1_ref[...], preferred_element_type=jnp.float32) + b1_ref[...]
    sig1 = jax.nn.sigmoid(x1)
    dx2 = g_ref[...] * w2_ref[...]                                   # (T,1)*(1,128)
    dx1 = dx2 * (sig1 * (1.0 + x1 * (1.0 - sig1)))
    dx0 = jnp.dot(dx1, w1t_ref[...], preferred_element_type=jnp.float32)
    dh_ref[...] = (dx0 * (sig_h * (1.0 + h * (1.0 - sig_h)))).astype(dh_ref.dtype)


def _ffn_fwd_pallas(hp, w1, b1, w2):
    rows = hp.shape[0]
    tile, grid = _tiles(rows)
    return pl.pallas_call(
        _ffn_fwd_kernel,
        out_shape=jax.ShapeDtypeStruct((rows, 1), jnp.float32),
        grid=(grid,),
        in_specs=[_row_spec(tile),
                  _resident((HPAD, HPAD)), _resident((1, HPAD)), _resident((1, HPAD))],
        out_specs=_col_spec(tile),
        compiler_params=_compiler_params(),
    )(hp, w1, b1, w2)


def _ffn_bwd_pallas(hp, g, w1, b1, w2, w1t):
    rows = hp.shape[0]
    tile, grid = _tiles(rows)
    return pl.pallas_call(
        _ffn_bwd_kernel,
        out_shape=jax.ShapeDtypeStruct((rows, HPAD), STREAM_DTYPE),
        grid=(grid,),
        in_specs=[_row_spec(tile), _col_spec(tile),
                  _resident((HPAD, HPAD)), _resident((1, HPAD)),
                  _resident((1, HPAD)), _resident((HPAD, HPAD))],
        out_specs=_row_spec(tile),
        compiler_params=_compiler_params(),
    )(hp, g, w1, b1, w2, w1t)


@jax.custom_vjp
def energy_ffn(hp, w1, w1t, b1, w2):
    return _ffn_fwd_pallas(hp, w1, b1, w2)


def _ffn_fwd(hp, w1, w1t, b1, w2):
    return _ffn_fwd_pallas(hp, w1, b1, w2), (hp, w1, w1t, b1, w2)


def _ffn_bwd(res, g):
    hp, w1, w1t, b1, w2 = res
    dh = _ffn_bwd_pallas(hp, g, w1, b1, w2, w1t)             # hot path (Pallas)
    # TODO(synk): weight cotangents omitted (zeros); see note in _enc_bwd.
    z = jnp.zeros_like
    return dh, z(w1), z(w1t), z(b1), z(w2)


energy_ffn.defvjp(_ffn_fwd, _ffn_bwd)


# ------------------------------- parameters ------------------------------------
def _pad_mat(w):
    return jnp.zeros((HPAD, HPAD), jnp.float32).at[:w.shape[0], :w.shape[1]].set(w)


def _pad_row(v):
    return jnp.zeros((1, HPAD), jnp.float32).at[:, :v.shape[1]].set(v)


def _pad_cols(t):
    return jnp.pad(t, ((0, 0), (0, HPAD - t.shape[1])))


def init_params(key, hidden=HIDDEN, edge_size=64):
    ks = jax.random.split(key, 8)
    s = 0.1
    enc_w = _pad_mat(jax.random.normal(ks[5], (hidden, hidden), jnp.float32) * s)
    ffn_w1 = _pad_mat(jax.random.normal(ks[6], (hidden, hidden), jnp.float32) * s)
    return dict(
        # Embedding tables pre-padded to HPAD lanes -> H_0 arrives lane-padded.
        block_emb=_pad_cols(jax.random.normal(ks[0], (NUM_BLOCK_TYPE, hidden), jnp.float32) * s),
        atom_emb=_pad_cols(jax.random.normal(ks[1], (NUM_ATOM_TYPE, hidden), jnp.float32) * s),
        pos_emb=_pad_cols(jax.random.normal(ks[2], (NUM_ATOM_POS, hidden), jnp.float32) * s),
        edge_emb=jax.random.normal(ks[3], (4, edge_size), jnp.float32) * s,  # unused by substitute encoder
        enc_wz=_pad_row(jax.random.normal(ks[4], (1, hidden), jnp.float32) * s),
        enc_w=enc_w, enc_wT=jnp.transpose(enc_w),               # transposed once here
        enc_b=jnp.zeros((1, HPAD), jnp.float32),
        ffn_w1=ffn_w1, ffn_w1T=jnp.transpose(ffn_w1),
        ffn_b1=jnp.zeros((1, HPAD), jnp.float32),
        ffn_w2=_pad_row(jax.random.normal(ks[7], (1, hidden), jnp.float32) * s),
        sigmas=jnp.exp(jnp.linspace(jnp.log(SIGMA_BEGIN), jnp.log(SIGMA_END),
                                    N_NOISE_LEVEL)).astype(jnp.float32),
    )


# -------------------------------- forward --------------------------------------
@partial(jax.jit, static_argnames=("return_noise", "return_loss"))
def forward(params, Z, B, A, atom_positions, block_lengths, lengths, segment_ids,
            label, rng, return_noise=True, return_loss=True):
    f32 = jnp.float32
    n_atoms = A.shape[0]
    n_blocks = B.shape[0]
    batch_size = lengths.shape[0]

    # ---- index bookkeeping (mirrors the torch.no_grad preprocessing) ----
    batch_id = jnp.zeros_like(segment_ids)
    batch_id = batch_id.at[jnp.cumsum(lengths)[:-1]].set(1)
    batch_id = jnp.cumsum(batch_id)
    block_id = jnp.zeros_like(A)
    block_id = block_id.at[jnp.cumsum(block_lengths)[:-1]].set(1)
    block_id = jnp.cumsum(block_id)
    batch_of_atom = batch_id[block_id]

    k1, k2, k3 = jax.random.split(rng, 3)

    # choose_receptor
    receptor_segment = (jax.random.normal(k1, (batch_size,)) > 0).astype(jnp.int32)

    # normalize — each batch has exactly one receptor global-block atom; pick it
    # with a masked segment_sum (static shapes, jittable).
    glb_block = (B == GLOBAL_BLOCK_ID)
    is_global_atom = glb_block[block_id]
    center_mask = is_global_atom & (segment_ids[block_id] ==
                                    receptor_segment[batch_of_atom])
    center = jax.ops.segment_sum(jnp.where(center_mask[:, None, None], Z, 0.0),
                                 batch_of_atom, num_segments=batch_size)
    Z = (Z - center[batch_of_atom]) / STD

    # perturb
    noise_level = jax.random.randint(k2, (batch_size,), 0, N_NOISE_LEVEL)
    used_sigmas = params['sigmas'][noise_level][batch_of_atom]
    perturb_block_mask = segment_ids == receptor_segment[batch_id]
    perturb_mask = perturb_block_mask[block_id]
    used_sigmas = jnp.where(perturb_mask, used_sigmas, 0.0)
    noise = jax.random.normal(k3, Z.shape, Z.dtype)
    Z_perturbed = Z + noise * used_sigmas[:, None, None]

    # update_global_block (masked segment_sum, static sizes, div-by-zero guarded)
    scatter_ids = jnp.clip(jnp.cumsum(is_global_atom.astype(jnp.int32)) - 1,
                           0, n_blocks - 1)
    not_global = ~is_global_atom
    sums = jax.ops.segment_sum(jnp.where(not_global[:, None, None], Z_perturbed, 0.0),
                               scatter_ids, num_segments=n_blocks)
    cnts = jax.ops.segment_sum(not_global.astype(f32), scatter_ids,
                               num_segments=n_blocks)
    centers = sums / jnp.maximum(cnts, 1.0)[:, None, None]
    Z_perturbed = jnp.where(is_global_atom[:, None, None],
                            centers[scatter_ids], Z_perturbed)

    # block embedding: tables are pre-padded to HPAD lanes -> only a small row pad
    H_0 = (params['block_emb'][B][block_id] + params['atom_emb'][A] +
           params['pos_emb'][atom_positions])                      # [n_atoms, HPAD]

    # TODO(synk): KNNBatchEdgeConstructor + edge_embedding + the real GET/SchNet
    # encoder are external modules not provided here; a simple differentiable
    # invariant encoder (Pallas kernels above) stands in for them.
    # TODO(synk): fusing the atom->block mean into the encoder kernel (scalar-
    # prefetched block offsets) and 4-rows-per-128-lane packing are left for a
    # follow-up; they matter only at much larger n_atoms.

    tile_a = _row_tile(n_atoms)
    n_pad = _round_up(n_atoms, tile_a)
    tile_b = _row_tile(n_blocks)
    nb_pad = _round_up(n_blocks, tile_b)

    h0_pad = jnp.pad(H_0, ((0, n_pad - n_atoms), (0, 0))).astype(STREAM_DTYPE)

    counts_blk = jnp.maximum(jax.ops.segment_sum(jnp.ones((n_atoms,), f32), block_id,
                                                 num_segments=n_blocks), 1.0)
    counts_bat = jnp.maximum(jax.ops.segment_sum(jnp.ones((n_blocks,), f32), batch_id,
                                                 num_segments=batch_size), 1.0)

    def energy_from_Z(Zp):
        # dist2 in plain jnp (tiny [n,3] op) so standard autodiff gives dZ from ddist2.
        d2 = jnp.sum(jnp.square(Zp.reshape(n_atoms, NC3)), axis=-1, keepdims=True)
        d2p = jnp.pad(d2, ((0, n_pad - n_atoms), (0, 0)))          # [n_pad,1] f32
        unit_s = encoder_unit(h0_pad, d2p, params['enc_wz'], params['enc_w'],
                              params['enc_wT'], params['enc_b'])   # Pallas, bf16
        unit = unit_s[:n_atoms].astype(f32)                        # [n_atoms,128]
        block_repr = (jax.ops.segment_sum(unit, block_id, num_segments=n_blocks)
                      / counts_blk[:, None])
        graph_repr = (jax.ops.segment_sum(block_repr, batch_id, num_segments=batch_size)
                      / counts_bat[:, None])
        block_pad = jnp.pad(block_repr,
                            ((0, nb_pad - n_blocks), (0, 0))).astype(STREAM_DTYPE)
        e_col = energy_ffn(block_pad, params['ffn_w1'], params['ffn_w1T'],
                           params['ffn_b1'], params['ffn_w2'])     # Pallas, [nb_pad,1]
        per_block_e = e_col[:n_blocks, 0]
        pred_energy = jax.ops.segment_sum(per_block_e, batch_id, num_segments=batch_size)
        return jnp.sum(pred_energy), (pred_energy, unit[:, :HIDDEN],
                                      block_repr[:, :HIDDEN], graph_repr[:, :HIDDEN])

    if return_noise or return_loss:
        (_, aux), dZ = jax.value_and_grad(energy_from_Z, has_aux=True)(Z_perturbed)
        pred_energy, unit_repr, block_repr, graph_repr = aux
        pred_noise = (-dZ).reshape(-1, N_CHANNEL, 3)   # pred_noise_from_energy
    else:
        _, aux = energy_from_Z(Z_perturbed)
        pred_energy, unit_repr, block_repr, graph_repr = aux
        pred_noise = None

    if return_loss:
        pmask = jnp.logical_and(perturb_mask, not_global).astype(f32)
        diff2 = jnp.sum((pred_noise - noise) ** 2, axis=(1, 2)) * pmask
        per_batch = jax.ops.segment_sum(diff2, batch_of_atom, num_segments=batch_size)
        noise_loss = 0.5 * jnp.mean(per_batch)
        loss, align_loss, noise_level_loss = noise_loss, 0.0, 0.0
    else:
        noise_loss = align_loss = noise_level_loss = loss = None

    return ReturnValue(energy=pred_energy, noise=pred_noise, noise_level=0,
                       unit_repr=unit_repr, block_repr=block_repr,
                       graph_repr=graph_repr, batch_id=batch_id, block_id=block_id,
                       loss=loss, noise_loss=noise_loss,
                       noise_level_loss=noise_level_loss, align_loss=align_loss)


# --------------------------------- demo ----------------------------------------
if __name__ == "__main__":
    key = jax.random.PRNGKey(0)
    kp, kd, kfwd = jax.random.split(key, 3)
    params = init_params(kp)

    # 2 graphs; each graph = 2 segments; each segment = 1 global block (1 atom)
    # followed by 2 normal blocks (2 atoms each) -> 12 blocks, 20 atoms total.
    lengths = jnp.array([6, 6], dtype=jnp.int32)
    segment_ids = jnp.array([0, 0, 0, 1, 1, 1, 0, 0, 0, 1, 1, 1], dtype=jnp.int32)
    B = jnp.array([GLOBAL_BLOCK_ID, 3, 5, GLOBAL_BLOCK_ID, 7, 2,
                   GLOBAL_BLOCK_ID, 4, 6, GLOBAL_BLOCK_ID, 8, 9], dtype=jnp.int32)
    block_lengths = jnp.array([1, 2, 2, 1, 2, 2, 1, 2, 2, 1, 2, 2], dtype=jnp.int32)
    n_atoms = int(block_lengths.sum())

    ka, kpz, kz = jax.random.split(kd, 3)
    A = jax.random.randint(ka, (n_atoms,), 0, NUM_ATOM_TYPE, dtype=jnp.int32)
    atom_positions = jax.random.randint(kpz, (n_atoms,), 0, NUM_ATOM_POS, dtype=jnp.int32)
    Z = jax.random.normal(kz, (n_atoms, N_CHANNEL, 3), jnp.float32) * 3.0
    label = jnp.zeros((2,), jnp.float32)

    out = forward(params, Z, B, A, atom_positions, block_lengths, lengths,
                  segment_ids, label, kfwd)
    jax.block_until_ready(out.energy)
    jax.block_until_ready(out.noise)
    jax.block_until_ready(out.loss)
    print("KERNEL_OK")
</pallas_src>

<mosaic_0001>
module attributes {stable_mosaic.version = 11 : i64} {
  func.func @_encoder_fwd_kernel(%arg0: i32, %arg1: memref<16x128xbf16, #tpu.memory_space<vmem>>, %arg2: memref<16x1xf32, #tpu.memory_space<vmem>>, %arg3: memref<1x128xf32, #tpu.memory_space<vmem>>, %arg4: memref<128x128xf32, #tpu.memory_space<vmem>>, %arg5: memref<1x128xf32, #tpu.memory_space<vmem>>, %arg6: memref<16x128xbf16, #tpu.memory_space<vmem>>) attributes {dimension_semantics = [#tpu.dimension_semantics<parallel>], iteration_bounds = array<i64: 2>, scalar_prefetch = 0 : i64, scratch_operands = 0 : i64, tpu.core_type = #tpu.core_type<tc>, window_params = [{transform_indices = @transform_0, window_bounds = array<i64: 16, 128>}, {transform_indices = @transform_1, window_bounds = array<i64: 16, 1>}, {pipeline_mode = #tpu.pipeline_mode<synchronous>, transform_indices = @transform_2, window_bounds = array<i64: 1, 128>}, {pipeline_mode = #tpu.pipeline_mode<synchronous>, transform_indices = @transform_3, window_bounds = array<i64: 128, 128>}, {pipeline_mode = #tpu.pipeline_mode<synchronous>, transform_indices = @transform_4, window_bounds = array<i64: 1, 128>}, {transform_indices = @transform_5, window_bounds = array<i64: 16, 128>}]} {
    %c0 = arith.constant 0 : index
    %c0_0 = arith.constant 0 : index
    %0 = vector.load %arg1[%c0, %c0_0] : memref<16x128xbf16, #tpu.memory_space<vmem>>, vector<16x128xbf16>
    %1 = arith.extf %0 : vector<16x128xbf16> to vector<16x128xf32>
    %c0_1 = arith.constant 0 : index
    %c0_2 = arith.constant 0 : index
    %2 = vector.load %arg2[%c0_1, %c0_2] : memref<16x1xf32, #tpu.memory_space<vmem>>, vector<16x1xf32>
    %c0_3 = arith.constant 0 : index
    %c0_4 = arith.constant 0 : index
    %3 = vector.load %arg3[%c0_3, %c0_4] : memref<1x128xf32, #tpu.memory_space<vmem>>, vector<1x128xf32>
    %4 = vector.broadcast %2 : vector<16x1xf32> to vector<16x128xf32>
    %5 = vector.broadcast %3 : vector<1x128xf32> to vector<16x128xf32>
    %6 = arith.mulf %4, %5 : vector<16x128xf32>
    %7 = arith.addf %1, %6 : vector<16x128xf32>
    %c0_5 = arith.constant 0 : index
    %c0_6 = arith.constant 0 : index
    %8 = vector.load %arg4[%c0_5, %c0_6] : memref<128x128xf32, #tpu.memory_space<vmem>>, vector<128x128xf32>
    %cst = arith.constant dense<0.000000e+00> : vector<16x128xf32>
    %9 = tpu.matmul %7, %8, %cst {dimension_numbers = #tpu.dot_dimension_numbers<[1], [0], [0], [1], [0, 0, 1, 1], [], []>} : vector<16x128xf32>, vector<128x128xf32>, vector<16x128xf32> -> vector<16x128xf32>
    %c0_7 = arith.constant 0 : index
    %c0_8 = arith.constant 0 : index
    %10 = vector.load %arg5[%c0_7, %c0_8] : memref<1x128xf32, #tpu.memory_space<vmem>>, vector<1x128xf32>
    %11 = vector.broadcast %10 : vector<1x128xf32> to vector<16x128xf32>
    %12 = arith.addf %9, %11 : vector<16x128xf32>
    %13 = arith.negf %12 : vector<16x128xf32>
    %14 = math.exp %13 : vector<16x128xf32>
    %cst_9 = arith.constant 1.000000e+00 : f32
    %15 = vector.broadcast %cst_9 : f32 to vector<16x128xf32>
    %16 = arith.addf %15, %14 : vector<16x128xf32>
    %17 = arith.divf %15, %16 : vector<16x128xf32>
    %18 = arith.mulf %12, %17 : vector<16x128xf32>
    %19 = arith.truncf %18 : vector<16x128xf32> to vector<16x128xbf16>
    %c0_10 = arith.constant 0 : index
    %c0_11 = arith.constant 0 : index
    %20 = vector.load %arg6[%c0_10, %c0_11] : memref<16x128xbf16, #tpu.memory_space<vmem>>, vector<16x128xbf16>
    tpu.vector_store %arg6[%c0_10, %c0_11], %19 {strides = array<i32>} : memref<16x128xbf16, #tpu.memory_space<vmem>>, vector<16x128xbf16>,
    return
  }
  func.func @transform_0(%arg0: i32) -> (i32, i32) {
    %c0_i32 = arith.constant 0 : i32
    %c0_i32_0 = arith.constant 0 : i32
    return %arg0, %c0_i32 : i32, i32
  }
  func.func @transform_1(%arg0: i32) -> (i32, i32) {
    %c0_i32 = arith.constant 0 : i32
    %c0_i32_0 = arith.constant 0 : i32
    return %arg0, %c0_i32 : i32, i32
  }
  func.func @transform_2(%arg0: i32) -> (i32, i32) {
    %c0_i32 = arith.constant 0 : i32
    %c0_i32_0 = arith.constant 0 : i32
    %c0_i32_1 = arith.constant 0 : i32
    return %c0_i32, %c0_i32_0 : i32, i32
  }
  func.func @transform_3(%arg0: i32) -> (i32, i32) {
    %c0_i32 = arith.constant 0 : i32
    %c0_i32_0 = arith.constant 0 : i32
    %c0_i32_1 = arith.constant 0 : i32
    return %c0_i32, %c0_i32_0 : i32, i32
  }
  func.func @transform_4(%arg0: i32) -> (i32, i32) {
    %c0_i32 = arith.constant 0 : i32
    %c0_i32_0 = arith.constant 0 : i32
    %c0_i32_1 = arith.constant 0 : i32
    return %c0_i32, %c0_i32_0 : i32, i32
  }
  func.func @transform_5(%arg0: i32) -> (i32, i32) {
    %c0_i32 = arith.constant 0 : i32
    %c0_i32_0 = arith.constant 0 : i32
    return %arg0, %c0_i32 : i32, i32
  }
}

module attributes {stable_mosaic.version = 11 : i64} {
  func.func @_ffn_fwd_kernel(%arg0: i32, %arg1: memref<16x128xbf16, #tpu.memory_space<vmem>>, %arg2: memref<128x128xf32, #tpu.memory_space<vmem>>, %arg3: memref<1x128xf32, #tpu.memory_space<vmem>>, %arg4: memref<1x128xf32, #tpu.memory_space<vmem>>, %arg5: memref<16x1xf32, #tpu.memory_space<vmem>>) attributes {dimension_semantics = [#tpu.dimension_semantics<parallel>], iteration_bounds = array<i64: 1>, scalar_prefetch = 0 : i64, scratch_operands = 0 : i64, tpu.core_type = #tpu.core_type<tc>, window_params = [{transform_indices = @transform_0, window_bounds = array<i64: 16, 128>}, {pipeline_mode = #tpu.pipeline_mode<synchronous>, transform_indices = @transform_1, window_bounds = array<i64: 128, 128>}, {pipeline_mode = #tpu.pipeline_mode<synchronous>, transform_indices = @transform_2, window_bounds = array<i64: 1, 128>}, {pipeline_mode = #tpu.pipeline_mode<synchronous>, transform_indices = @transform_3, window_bounds = array<i64: 1, 128>}, {transform_indices = @transform_4, window_bounds = array<i64: 16, 1>}]} {
    %c0 = arith.constant 0 : index
    %c0_0 = arith.constant 0 : index
    %0 = vector.load %arg1[%c0, %c0_0] : memref<16x128xbf16, #tpu.memory_space<vmem>>, vector<16x128xbf16>
    %1 = arith.extf %0 : vector<16x128xbf16> to vector<16x128xf32>
    %2 = arith.negf %1 : vector<16x128xf32>
    %3 = math.exp %2 : vector<16x128xf32>
    %cst = arith.constant 1.000000e+00 : f32
    %4 = vector.broadcast %cst : f32 to vector<16x128xf32>
    %5 = arith.addf %4, %3 : vector<16x128xf32>
    %6 = arith.divf %4, %5 : vector<16x128xf32>
    %7 = arith.mulf %1, %6 : vector<16x128xf32>
    %c0_1 = arith.constant 0 : index
    %c0_2 = arith.constant 0 : index
    %8 = vector.load %arg2[%c0_1, %c0_2] : memref<128x128xf32, #tpu.memory_space<vmem>>, vector<128x128xf32>
    %cst_3 = arith.constant dense<0.000000e+00> : vector<16x128xf32>
    %9 = tpu.matmul %7, %8, %cst_3 {dimension_numbers = #tpu.dot_dimension_numbers<[1], [0], [0], [1], [0, 0, 1, 1], [], []>} : vector<16x128xf32>, vector<128x128xf32>, vector<16x128xf32> -> vector<16x128xf32>
    %c0_4 = arith.constant 0 : index
    %c0_5 = arith.constant 0 : index
    %10 = vector.load %arg3[%c0_4, %c0_5] : memref<1x128xf32, #tpu.memory_space<vmem>>, vector<1x128xf32>
    %11 = vector.broadcast %10 : vector<1x128xf32> to vector<16x128xf32>
    %12 = arith.addf %9, %11 : vector<16x128xf32>
    %13 = arith.negf %12 : vector<16x128xf32>
    %14 = math.exp %13 : vector<16x128xf32>
    %cst_6 = arith.constant 1.000000e+00 : f32
    %15 = vector.broadcast %cst_6 : f32 to vector<16x128xf32>
    %16 = arith.addf %15, %14 : vector<16x128xf32>
    %17 = arith.divf %15, %16 : vector<16x128xf32>
    %18 = arith.mulf %12, %17 : vector<16x128xf32>
    %c0_7 = arith.constant 0 : index
    %c0_8 = arith.constant 0 : index
    %19 = vector.load %arg4[%c0_7, %c0_8] : memref<1x128xf32, #tpu.memory_space<vmem>>, vector<1x128xf32>
    %20 = vector.broadcast %19 : vector<1x128xf32> to vector<16x128xf32>
    %21 = arith.mulf %18, %20 : vector<16x128xf32>
    %cst_9 = arith.constant dense<0.000000e+00> : vector<16xf32>
    %22 = vector.multi_reduction <add>, %21, %cst_9 [1] : vector<16x128xf32> to vector<16xf32>
    %23 = vector.shape_cast %22 : vector<16xf32> to vector<16x1xf32>
    %c0_10 = arith.constant 0 : index
    %c0_11 = arith.constant 0 : index
    %24 = vector.load %arg5[%c0_10, %c0_11] : memref<16x1xf32, #tpu.memory_space<vmem>>, vector<16x1xf32>
    tpu.vector_store %arg5[%c0_10, %c0_11], %23 {strides = array<i32>} : memref<16x1xf32, #tpu.memory_space<vmem>>, vector<16x1xf32>,
    return
  }
  func.func @transform_0(%arg0: i32) -> (i32, i32) {
    %c0_i32 = arith.constant 0 : i32
    %c0_i32_0 = arith.constant 0 : i32
    return %arg0, %c0_i32 : i32, i32
  }
  func.func @transform_1(%arg0: i32) -> (i32, i32) {
    %c0_i32 = arith.constant 0 : i32
    %c0_i32_0 = arith.constant 0 : i32
    %c0_i32_1 = arith.constant 0 : i32
    return %c0_i32, %c0_i32_0 : i32, i32
  }
  func.func @transform_2(%arg0: i32) -> (i32, i32) {
    %c0_i32 = arith.constant 0 : i32
    %c0_i32_0 = arith.constant 0 : i32
    %c0_i32_1 = arith.constant 0 : i32
    return %c0_i32, %c0_i32_0 : i32, i32
  }
  func.func @transform_3(%arg0: i32) -> (i32, i32) {
    %c0_i32 = arith.constant 0 : i32
    %c0_i32_0 = arith.constant 0 : i32
    %c0_i32_1 = arith.constant 0 : i32
    return %c0_i32, %c0_i32_0 : i32, i32
  }
  func.func @transform_4(%arg0: i32) -> (i32, i32) {
    %c0_i32 = arith.constant 0 : i32
    %c0_i32_0 = arith.constant 0 : i32
    return %arg0, %c0_i32 : i32, i32
  }
}

module attributes {stable_mosaic.version = 11 : i64} {
  func.func @_ffn_bwd_kernel(%arg0: i32, %arg1: memref<16x128xbf16, #tpu.memory_space<vmem>>, %arg2: memref<16x1xf32, #tpu.memory_space<vmem>>, %arg3: memref<128x128xf32, #tpu.memory_space<vmem>>, %arg4: memref<1x128xf32, #tpu.memory_space<vmem>>, %arg5: memref<1x128xf32, #tpu.memory_space<vmem>>, %arg6: memref<128x128xf32, #tpu.memory_space<vmem>>, %arg7: memref<16x128xbf16, #tpu.memory_space<vmem>>) attributes {dimension_semantics = [#tpu.dimension_semantics<parallel>], iteration_bounds = array<i64: 1>, scalar_prefetch = 0 : i64, scratch_operands = 0 : i64, tpu.core_type = #tpu.core_type<tc>, window_params = [{transform_indices = @transform_0, window_bounds = array<i64: 16, 128>}, {transform_indices = @transform_1, window_bounds = array<i64: 16, 1>}, {pipeline_mode = #tpu.pipeline_mode<synchronous>, transform_indices = @transform_2, window_bounds = array<i64: 128, 128>}, {pipeline_mode = #tpu.pipeline_mode<synchronous>, transform_indices = @transform_3, window_bounds = array<i64: 1, 128>}, {pipeline_mode = #tpu.pipeline_mode<synchronous>, transform_indices = @transform_4, window_bounds = array<i64: 1, 128>}, {pipeline_mode = #tpu.pipeline_mode<synchronous>, transform_indices = @transform_5, window_bounds = array<i64: 128, 128>}, {transform_indices = @transform_6, window_bounds = array<i64: 16, 128>}]} {
    %c0 = arith.constant 0 : index
    %c0_0 = arith.constant 0 : index
    %0 = vector.load %arg1[%c0, %c0_0] : memref<16x128xbf16, #tpu.memory_space<vmem>>, vector<16x128xbf16>
    %1 = arith.extf %0 : vector<16x128xbf16> to vector<16x128xf32>
    %2 = arith.negf %1 : vector<16x128xf32>
    %3 = math.exp %2 : vector<16x128xf32>
    %cst = arith.constant 1.000000e+00 : f32
    %4 = vector.broadcast %cst : f32 to vector<16x128xf32>
    %5 = arith.addf %4, %3 : vector<16x128xf32>
    %6 = arith.divf %4, %5 : vector<16x128xf32>
    %7 = arith.mulf %1, %6 : vector<16x128xf32>
    %c0_1 = arith.constant 0 : index
    %c0_2 = arith.constant 0 : index
    %8 = vector.load %arg3[%c0_1, %c0_2] : memref<128x128xf32, #tpu.memory_space<vmem>>, vector<128x128xf32>
    %cst_3 = arith.constant dense<0.000000e+00> : vector<16x128xf32>
    %9 = tpu.matmul %7, %8, %cst_3 {dimension_numbers = #tpu.dot_dimension_numbers<[1], [0], [0], [1], [0, 0, 1, 1], [], []>} : vector<16x128xf32>, vector<128x128xf32>, vector<16x128xf32> -> vector<16x128xf32>
    %c0_4 = arith.constant 0 : index
    %c0_5 = arith.constant 0 : index
    %10 = vector.load %arg4[%c0_4, %c0_5] : memref<1x128xf32, #tpu.memory_space<vmem>>, vector<1x128xf32>
    %11 = vector.broadcast %10 : vector<1x128xf32> to vector<16x128xf32>
    %12 = arith.addf %9, %11 : vector<16x128xf32>
    %13 = arith.negf %12 : vector<16x128xf32>
    %14 = math.exp %13 : vector<16x128xf32>
    %cst_6 = arith.constant 1.000000e+00 : f32
    %15 = vector.broadcast %cst_6 : f32 to vector<16x128xf32>
    %16 = arith.addf %15, %14 : vector<16x128xf32>
    %17 = arith.divf %15, %16 : vector<16x128xf32>
    %c0_7 = arith.constant 0 : index
    %c0_8 = arith.constant 0 : index
    %18 = vector.load %arg2[%c0_7, %c0_8] : memref<16x1xf32, #tpu.memory_space<vmem>>, vector<16x1xf32>
    %c0_9 = arith.constant 0 : index
    %c0_10 = arith.constant 0 : index
    %19 = vector.load %arg5[%c0_9, %c0_10] : memref<1x128xf32, #tpu.memory_space<vmem>>, vector<1x128xf32>
    %20 = vector.broadcast %18 : vector<16x1xf32> to vector<16x128xf32>
    %21 = vector.broadcast %19 : vector<1x128xf32> to vector<16x128xf32>
    %22 = arith.mulf %20, %21 : vector<16x128xf32>
    %cst_11 = arith.constant 1.000000e+00 : f32
    %23 = vector.broadcast %cst_11 : f32 to vector<16x128xf32>
    %24 = arith.subf %23, %17 : vector<16x128xf32>
    %25 = arith.mulf %12, %24 : vector<16x128xf32>
    %cst_12 = arith.constant 1.000000e+00 : f32
    %26 = vector.broadcast %cst_12 : f32 to vector<16x128xf32>
    %27 = arith.addf %26, %25 : vector<16x128xf32>
    %28 = arith.mulf %17, %27 : vector<16x128xf32>
    %29 = arith.mulf %22, %28 : vector<16x128xf32>
    %c0_13 = arith.constant 0 : index
    %c0_14 = arith.constant 0 : index
    %30 = vector.load %arg6[%c0_13, %c0_14] : memref<128x128xf32, #tpu.memory_space<vmem>>, vector<128x128xf32>
    %cst_15 = arith.constant dense<0.000000e+00> : vector<16x128xf32>
    %31 = tpu.matmul %29, %30, %cst_15 {dimension_numbers = #tpu.dot_dimension_numbers<[1], [0], [0], [1], [0, 0, 1, 1], [], []>} : vector<16x128xf32>, vector<128x128xf32>, vector<16x128xf32> -> vector<16x128xf32>
    %cst_16 = arith.constant 1.000000e+00 : f32
    %32 = vector.broadcast %cst_16 : f32 to vector<16x128xf32>
    %33 = arith.subf %32, %6 : vector<16x128xf32>
    %34 = arith.mulf %1, %33 : vector<16x128xf32>
    %cst_17 = arith.constant 1.000000e+00 : f32
    %35 = vector.broadcast %cst_17 : f32 to vector<16x128xf32>
    %36 = arith.addf %35, %34 : vector<16x128xf32>
    %37 = arith.mulf %6, %36 : vector<16x128xf32>
    %38 = arith.mulf %31, %37 : vector<16x128xf32>
    %39 = arith.truncf %38 : vector<16x128xf32> to vector<16x128xbf16>
    %c0_18 = arith.constant 0 : index
    %c0_19 = arith.constant 0 : index
    %40 = vector.load %arg7[%c0_18, %c0_19] : memref<16x128xbf16, #tpu.memory_space<vmem>>, vector<16x128xbf16>
    tpu.vector_store %arg7[%c0_18, %c0_19], %39 {strides = array<i32>} : memref<16x128xbf16, #tpu.memory_space<vmem>>, vector<16x128xbf16>,
    return
  }
  func.func @transform_0(%arg0: i32) -> (i32, i32) {
    %c0_i32 = arith.constant 0 : i32
    %c0_i32_0 = arith.constant 0 : i32
    return %arg0, %c0_i32 : i32, i32
  }
  func.func @transform_1(%arg0: i32) -> (i32, i32) {
    %c0_i32 = arith.constant 0 : i32
    %c0_i32_0 = arith.constant 0 : i32
    return %arg0, %c0_i32 : i32, i32
  }
  func.func @transform_2(%arg0: i32) -> (i32, i32) {
    %c0_i32 = arith.constant 0 : i32
    %c0_i32_0 = arith.constant 0 : i32
    %c0_i32_1 = arith.constant 0 : i32
    return %c0_i32, %c0_i32_0 : i32, i32
  }
  func.func @transform_3(%arg0: i32) -> (i32, i32) {
    %c0_i32 = arith.constant 0 : i32
    %c0_i32_0 = arith.constant 0 : i32
    %c0_i32_1 = arith.constant 0 : i32
    return %c0_i32, %c0_i32_0 : i32, i32
  }
  func.func @transform_4(%arg0: i32) -> (i32, i32) {
    %c0_i32 = arith.constant 0 : i32
    %c0_i32_0 = arith.constant 0 : i32
    %c0_i32_1 = arith.constant 0 : i32
    return %c0_i32, %c0_i32_0 : i32, i32
  }
  func.func @transform_5(%arg0: i32) -> (i32, i32) {
    %c0_i32 = arith.constant 0 : i32
    %c0_i32_0 = arith.constant 0 : i32
    %c0_i32_1 = arith.constant 0 : i32
    return %c0_i32, %c0_i32_0 : i32, i32
  }
  func.func @transform_6(%arg0: i32) -> (i32, i32) {
    %c0_i32 = arith.constant 0 : i32
    %c0_i32_0 = arith.constant 0 : i32
    return %arg0, %c0_i32 : i32, i32
  }
}

module attributes {stable_mosaic.version = 11 : i64} {
  func.func @_encoder_bwd_kernel(%arg0: i32, %arg1: memref<16x128xbf16, #tpu.memory_space<vmem>>, %arg2: memref<16x1xf32, #tpu.memory_space<vmem>>, %arg3: memref<16x128xbf16, #tpu.memory_space<vmem>>, %arg4: memref<1x128xf32, #tpu.memory_space<vmem>>, %arg5: memref<128x128xf32, #tpu.memory_space<vmem>>, %arg6: memref<128x128xf32, #tpu.memory_space<vmem>>, %arg7: memref<1x128xf32, #tpu.memory_space<vmem>>, %arg8: memref<16x1xf32, #tpu.memory_space<vmem>>) attributes {dimension_semantics = [#tpu.dimension_semantics<parallel>], iteration_bounds = array<i64: 2>, scalar_prefetch = 0 : i64, scratch_operands = 0 : i64, tpu.core_type = #tpu.core_type<tc>, window_params = [{transform_indices = @transform_0, window_bounds = array<i64: 16, 128>}, {transform_indices = @transform_1, window_bounds = array<i64: 16, 1>}, {transform_indices = @transform_2, window_bounds = array<i64: 16, 128>}, {pipeline_mode = #tpu.pipeline_mode<synchronous>, transform_indices = @transform_3, window_bounds = array<i64: 1, 128>}, {pipeline_mode = #tpu.pipeline_mode<synchronous>, transform_indices = @transform_4, window_bounds = array<i64: 128, 128>}, {pipeline_mode = #tpu.pipeline_mode<synchronous>, transform_indices = @transform_5, window_bounds = array<i64: 128, 128>}, {pipeline_mode = #tpu.pipeline_mode<synchronous>, transform_indices = @transform_6, window_bounds = array<i64: 1, 128>}, {transform_indices = @transform_7, window_bounds = array<i64: 16, 1>}]} {
    %c0 = arith.constant 0 : index
    %c0_0 = arith.constant 0 : index
    %0 = vector.load %arg1[%c0, %c0_0] : memref<16x128xbf16, #tpu.memory_space<vmem>>, vector<16x128xbf16>
    %1 = arith.extf %0 : vector<16x128xbf16> to vector<16x128xf32>
    %c0_1 = arith.constant 0 : index
    %c0_2 = arith.constant 0 : index
    %2 = vector.load %arg4[%c0_1, %c0_2] : memref<1x128xf32, #tpu.memory_space<vmem>>, vector<1x128xf32>
    %c0_3 = arith.constant 0 : index
    %c0_4 = arith.constant 0 : index
    %3 = vector.load %arg2[%c0_3, %c0_4] : memref<16x1xf32, #tpu.memory_space<vmem>>, vector<16x1xf32>
    %4 = vector.broadcast %3 : vector<16x1xf32> to vector<16x128xf32>
    %5 = vector.broadcast %2 : vector<1x128xf32> to vector<16x128xf32>
    %6 = arith.mulf %4, %5 : vector<16x128xf32>
    %7 = arith.addf %1, %6 : vector<16x128xf32>
    %c0_5 = arith.constant 0 : index
    %c0_6 = arith.constant 0 : index
    %8 = vector.load %arg5[%c0_5, %c0_6] : memref<128x128xf32, #tpu.memory_space<vmem>>, vector<128x128xf32>
    %cst = arith.constant dense<0.000000e+00> : vector<16x128xf32>
    %9 = tpu.matmul %7, %8, %cst {dimension_numbers = #tpu.dot_dimension_numbers<[1], [0], [0], [1], [0, 0, 1, 1], [], []>} : vector<16x128xf32>, vector<128x128xf32>, vector<16x128xf32> -> vector<16x128xf32>
    %c0_7 = arith.constant 0 : index
    %c0_8 = arith.constant 0 : index
    %10 = vector.load %arg7[%c0_7, %c0_8] : memref<1x128xf32, #tpu.memory_space<vmem>>, vector<1x128xf32>
    %11 = vector.broadcast %10 : vector<1x128xf32> to vector<16x128xf32>
    %12 = arith.addf %9, %11 : vector<16x128xf32>
    %13 = arith.negf %12 : vector<16x128xf32>
    %14 = math.exp %13 : vector<16x128xf32>
    %cst_9 = arith.constant 1.000000e+00 : f32
    %15 = vector.broadcast %cst_9 : f32 to vector<16x128xf32>
    %16 = arith.addf %15, %14 : vector<16x128xf32>
    %17 = arith.divf %15, %16 : vector<16x128xf32>
    %c0_10 = arith.constant 0 : index
    %c0_11 = arith.constant 0 : index
    %18 = vector.load %arg3[%c0_10, %c0_11] : memref<16x128xbf16, #tpu.memory_space<vmem>>, vector<16x128xbf16>
    %19 = arith.extf %18 : vector<16x128xbf16> to vector<16x128xf32>
    %cst_12 = arith.constant 1.000000e+00 : f32
    %20 = vector.broadcast %cst_12 : f32 to vector<16x128xf32>
    %21 = arith.subf %20, %17 : vector<16x128xf32>
    %22 = arith.mulf %12, %21 : vector<16x128xf32>
    %cst_13 = arith.constant 1.000000e+00 : f32
    %23 = vector.broadcast %cst_13 : f32 to vector<16x128xf32>
    %24 = arith.addf %23, %22 : vector<16x128xf32>
    %25 = arith.mulf %17, %24 : vector<16x128xf32>
    %26 = arith.mulf %19, %25 : vector<16x128xf32>
    %c0_14 = arith.constant 0 : index
    %c0_15 = arith.constant 0 : index
    %27 = vector.load %arg6[%c0_14, %c0_15] : memref<128x128xf32, #tpu.memory_space<vmem>>, vector<128x128xf32>
    %cst_16 = arith.constant dense<0.000000e+00> : vector<16x128xf32>
    %28 = tpu.matmul %26, %27, %cst_16 {dimension_numbers = #tpu.dot_dimension_numbers<[1], [0], [0], [1], [0, 0, 1, 1], [], []>} : vector<16x128xf32>, vector<128x128xf32>, vector<16x128xf32> -> vector<16x128xf32>
    %29 = vector.broadcast %2 : vector<1x128xf32> to vector<16x128xf32>
    %30 = arith.mulf %28, %29 : vector<16x128xf32>
    %cst_17 = arith.constant dense<0.000000e+00> : vector<16xf32>
    %31 = vector.multi_reduction <add>, %30, %cst_17 [1] : vector<16x128xf32> to vector<16xf32>
    %32 = vector.shape_cast %31 : vector<16xf32> to vector<16x1xf32>
    %c0_18 = arith.constant 0 : index
    %c0_19 = arith.constant 0 : index
    %33 = vector.load %arg8[%c0_18, %c0_19] : memref<16x1xf32, #tpu.memory_space<vmem>>, vector<16x1xf32>
    tpu.vector_store %arg8[%c0_18, %c0_19], %32 {strides = array<i32>} : memref<16x1xf32, #tpu.memory_space<vmem>>, vector<16x1xf32>,
    return
  }
  func.func @transform_0(%arg0: i32) -> (i32, i32) {
    %c0_i32 = arith.constant 0 : i32
    %c0_i32_0 = arith.constant 0 : i32
    return %arg0, %c0_i32 : i32, i32
  }
  func.func @transform_1(%arg0: i32) -> (i32, i32) {
    %c0_i32 = arith.constant 0 : i32
    %c0_i32_0 = arith.constant 0 : i32
    return %arg0, %c0_i32 : i32, i32
  }
  func.func @transform_2(%arg0: i32) -> (i32, i32) {
    %c0_i32 = arith.constant 0 : i32
    %c0_i32_0 = arith.constant 0 : i32
    return %arg0, %c0_i32 : i32, i32
  }
  func.func @transform_3(%arg0: i32) -> (i32, i32) {
    %c0_i32 = arith.constant 0 : i32
    %c0_i32_0 = arith.constant 0 : i32
    %c0_i32_1 = arith.constant 0 : i32
    return %c0_i32, %c0_i32_0 : i32, i32
  }
  func.func @transform_4(%arg0: i32) -> (i32, i32) {
    %c0_i32 = arith.constant 0 : i32
    %c0_i32_0 = arith.constant 0 : i32
    %c0_i32_1 = arith.constant 0 : i32
    return %c0_i32, %c0_i32_0 : i32, i32
  }
  func.func @transform_5(%arg0: i32) -> (i32, i32) {
    %c0_i32 = arith.constant 0 : i32
    %c0_i32_0 = arith.constant 0 : i32
    %c0_i32_1 = arith.constant 0 : i32
    return %c0_i32, %c0_i32_0 : i32, i32
  }
  func.func @transform_6(%arg0: i32) -> (i32, i32) {
    %c0_i32 = arith.constant 0 : i32
    %c0_i32_0 = arith.constant 0 : i32
    %c0_i32_1 = arith.constant 0 : i32
    return %c0_i32, %c0_i32_0 : i32, i32
  }
  func.func @transform_7(%arg0: i32) -> (i32, i32) {
    %c0_i32 = arith.constant 0 : i32
    %c0_i32_0 = arith.constant 0 : i32
    return %arg0, %c0_i32 : i32, i32
  }
}

</mosaic_0001>

<bundles_post_ra>
// kernel: eq.5
= control target key start
LH: loop header
LB: loop body
LE: loop exit
PB: predicated region body
PF: predicated region fallthrough
CT: control target
= control target key end

     0   :  { %v16_v2 = vmov 0   ;;  %s41_s0 = inlined_call_operand.vmem [shape: s32[12], index: 0, kind: input, shape index: {}]   ;;  %s42_s1 = inlined_call_operand.vmem [shape: s32[12], index: 1, kind: input, shape index: {}]   ;;  %s43_s2 = inlined_call_operand.vmem [shape: pred[12], index: 2, kind: output, shape index: {}]  }
   0x1   :  { %v3_v0 = vld [vmem:[%s41_s0] sm:$0x1] }
   0x2   :  { %v4_v1 = vld [vmem:[%s42_s1] sm:$0x1] }
   0x3   :  { %vm7_vm0 = vcmp.eq.s32.totalorder %v3_v0, %v4_v1 }
   0x4   :  { %v8_v3 = vsel %vm7_vm0, 1, %v16_v2 }
   0x5   :  { %v10_v4 = vpack.c.b16 %v16_v2, %v8_v3 }
   0x7   :  { %v11_v5 = vpack.c.b8 %v16_v2, %v10_v4 }
   0x9   :  { %14 = vst [vmem:[%s43_s2] sm:$0x1] %v11_v5 }

// kernel: jvp__.3
= control target key start
LH: loop header
LB: loop body
LE: loop exit
PB: predicated region body
PF: predicated region fallthrough
CT: control target
= control target key end

     0   :  { %vm160_vm0 = vcmask 7168   ;;  %s334_s1 = inlined_call_operand.vmem [shape: f32[128,128], index: 1, kind: input, shape index: {}]   ;;  %s335_s0 = inlined_call_operand.vmem [shape: bf16[16,128], index: 0, kind: input, shape index: {}]   ;;  %s336_s2 = inlined_call_operand.vmem [shape: f32[1,128], index: 2, kind: input, shape index: {}]   ;;  %s337_s3 = inlined_call_operand.vmem [shape: f32[1,128], index: 3, kind: input, shape index: {}]   ;;  %s338_s4 = inlined_call_operand.vmem [shape: f32[16,1], index: 4, kind: output, shape index: {}]  }
   0x1   :  { %v50_v0 = vld [vmem:[%s334_s1 + $0x78] sm:$0xff]  ;;  %v49_v1 = vld [vmem:[%s334_s1 + $0x70] sm:$0xff]  ;;  %v48_v2 = vld [vmem:[%s334_s1 + $0x68] sm:$0xff] }
   0x2   :  { %195 = vmatprep.subr.mxu0 %v50_v0  ;;  %v47_v3 = vld [vmem:[%s334_s1 + $0x60] sm:$0xff]  ;;  %v46_v5 = vld [vmem:[%s334_s1 + $0x58] sm:$0xff]  ;;  %v45_v8 = vld [vmem:[%s334_s1 + $0x50] sm:$0xff] }
   0x3   :  { %196 = vmatpush3.msra.mxu0 %v50_v0  ;;  %v174_v4 = vld [vmem:[%s335_s0] sm:$0xff]   ;;  %v44_v11 = vld [vmem:[%s334_s1 + $0x48] sm:$0xff]  ;;  %v42_v13 = vld [vmem:[%s334_s1 + $0x38] sm:$0xff] }
   0x4   :  { %197 = vmatprep.subr.mxu0 %v49_v1  ;;  %v175_v6 = vunpack.c.l.bf16 %v174_v4  ;;  %v176_v7 = vunpack.c.h.bf16 %v174_v4  ;;  %v43_v12 = vld [vmem:[%s334_s1 + $0x40] sm:$0xff]  ;;  %v41_v14 = vld [vmem:[%s334_s1 + $0x30] sm:$0xff]  ;;  %v40_v15 = vld [vmem:[%s334_s1 + $0x28] sm:$0xff] }
   0x5   :  { %198 = vmatpush3.msra.mxu0 %v49_v1  ;;  %v39_v16 = vld [vmem:[%s334_s1 + $0x20] sm:$0xff]  ;;  %v38_v17 = vld [vmem:[%s334_s1 + $0x18] sm:$0xff]  ;;  %v37_v20 = vld [vmem:[%s334_s1 + $0x10] sm:$0xff] }
   0x6   :  { %199 = vmatprep.subr.mxu0 %v48_v2  ;;  %v167_v9 = vmul.f32 -1.442695, %v175_v6  ;;  %v168_v10 = vmul.f32 -1.442695, %v176_v7  ;;  %v36_v23 = vld [vmem:[%s334_s1 + $0x8] sm:$0xff]  ;;  %v35_v24 = vld [vmem:[%s334_s1] sm:$0xff] }
   0x7   :  { %200 = vmatpush3.msra.mxu0 %v48_v2  ;;  %v169_v29 = vld [vmem:[%s336_s2] ss:$0 sm:$0xff] }
   0x8   :  { %201 = vmatprep.subr.mxu0 %v47_v3  ;;  %230 = vpow2.f32 %v167_v9  ;;  %v172_v43 = vld [vmem:[%s337_s3] ss:$0 sm:$0xff] }
   0x9   :  { %202 = vmatpush3.msra.mxu0 %v47_v3  ;;  %232 = vpow2.f32 %v168_v10 }
   0xa   :  { %203 = vmatprep.subr.mxu0 %v46_v5 }
   0xb   :  { %204 = vmatpush3.msra.mxu0 %v46_v5 }
   0xc   :  { %205 = vmatprep.subr.mxu0 %v45_v8 }
   0xd   :  { %206 = vmatpush3.msra.mxu0 %v45_v8 }
   0xe   :  { %207 = vmatprep.subr.mxu0 %v44_v11 }
   0xf   :  { %208 = vmatpush3.msra.mxu0 %v44_v11 }
  0x10   :  { %209 = vmatprep.subr.mxu0 %v43_v12 }
  0x11   :  { %210 = vmatpush3.msra.mxu0 %v43_v12 }
  0x12   :  { %211 = vmatprep.subr.mxu0 %v42_v13 }
  0x13   :  { %212 = vmatpush3.msra.mxu0 %v42_v13 }
  0x14   :  { %213 = vmatprep.subr.mxu0 %v41_v14 }
  0x15   :  { %214 = vmatpush3.msra.mxu0 %v41_v14  ;;  %v231_v18 = vpop.eup %230 }
  0x16   :  { %215 = vmatprep.subr.mxu0 %v40_v15  ;;  %v233_v19 = vpop.eup %232  ;;  %v27_v21 = vadd.f32 1.0, %v231_v18 }
  0x17   :  { %216 = vmatpush3.msra.mxu0 %v40_v15  ;;  %v28_v22 = vadd.f32 1.0, %v233_v19 }
  0x18   :  { %217 = vmatprep.subr.mxu0 %v39_v16  ;;  %234 = vrcp.f32 %v27_v21 }
  0x19   :  { %218 = vmatpush3.msra.mxu0 %v39_v16  ;;  %236 = vrcp.f32 %v28_v22 }
  0x1a   :  { %219 = vmatprep.subr.mxu0 %v38_v17 }
  0x1b   :  { %220 = vmatpush3.msra.mxu0 %v38_v17 }
  0x1c   :  { %221 = vmatprep.subr.mxu0 %v37_v20 }
  0x1d   :  { %222 = vmatpush3.msra.mxu0 %v37_v20 }
  0x1e   :  { %223 = vmatprep.subr.mxu0 %v36_v23 }
  0x1f   :  { %224 = vmatpush3.msra.mxu0 %v36_v23 }
  0x20   :  { %225 = vmatprep.subr.mxu0 %v35_v24 }
  0x21   :  { %226 = vmatpush3.msra.mxu0 %v35_v24 }
  0x25   :  { %v235_v25 = vpop.eup %234 }
  0x26   :  { %v237_v26 = vpop.eup %236  ;;  %v33_v27 = vmul.f32 %v235_v25, %v175_v6 }
  0x27   :  { %v34_v28 = vmul.f32 %v237_v26, %v176_v7 }
  0x28   :  { %227 = vmatprep.mubr.f32.mxu0 %v33_v27 }
  0x29   :  { %228 = vmatmul.mubr.f32.vlgmr.msra.gmra.mxu0 %v34_v28 }
  0xe9   :  { %v229_v30 = vpop.f32.mrf.mxu0 }
  0xea   :  { %v130_v31 = vadd.f32 %v229_v30, %v169_v29 }
  0xeb   :  { %v124_v32 = vpop.f32.mrf.mxu0 }
  0xec   :  { %v171_v33 = vmul.f32 -1.442695, %v130_v31  ;;  %v125_v34 = vadd.f32 %v169_v29, %v124_v32 }
  0xee   :  { %238 = vpow2.f32 %v171_v33  ;;  %v170_v35 = vmul.f32 -1.442695, %v125_v34 }
  0xf0   :  { %240 = vpow2.f32 %v170_v35 }
  0xfb   :  { %v239_v36 = vpop.eup %238 }
  0xfc   :  { %v140_v37 = vadd.f32 1.0, %v239_v36 }
  0xfd   :  { %v241_v38 = vpop.eup %240 }
  0xfe   :  { %v139_v39 = vadd.f32 1.0, %v241_v38  ;;  %242 = vrcp.f32 %v140_v37 }
 0x100   :  { %244 = vrcp.f32 %v139_v39 }
 0x10b   :  { %v243_v40 = vpop.eup %242 }
 0x10c   :  { %v146_v44 = vmul.f32 %v243_v40, %v130_v31 }
 0x10d   :  { %v245_v41 = vpop.eup %244 }
 0x10e   :  { %v145_v42 = vmul.f32 %v245_v41, %v125_v34  ;;  %v155_v46 = vmul.f32 %v172_v43, %v146_v44 }
 0x110   :  { %v154_v45 = vmul.f32 %v172_v43, %v145_v42 }
 0x112   :  { %156 = vadd.xlane.f32.xlu0 %v154_v45 }
 0x116   :  { %158 = vadd.xlane.f32.xlu0 %v155_v46 }
 0x19b   :  { %v157_v47 = vpop.xlane.xlu0 %156 }
 0x19c   :  { %161 = vst.msk [vmem:[%s338_s4] sm:$0xff] %vm160_vm0, %v157_v47 }
 0x19f   :  { %v159_v48 = vpop.xlane.xlu0 %158 }
 0x1a0   :  { %162 = vst.msk [vmem:[%s338_s4 + $0x8] sm:$0xff] %vm160_vm0, %v159_v48 }

// kernel: jvp__.2
= control target key start
LH: loop header
LB: loop body
LE: loop exit
PB: predicated region body
PF: predicated region fallthrough
CT: control target
= control target key end

     0   :  { %s607_s18 = smov 0   ;;  %s689_s0 = inlined_call_operand.vmem [shape: bf16[32,128], index: 0, kind: input, shape index: {}]   ;;  %s690_s1 = inlined_call_operand.vmem [shape: f32[32,1], index: 1, kind: input, shape index: {}]   ;;  %s691_s2 = inlined_call_operand.vmem [shape: f32[1,128], index: 2, kind: input, shape index: {}]   ;;  %s692_s3 = inlined_call_operand.vmem [shape: f32[128,128], index: 3, kind: input, shape index: {}]   ;;  %s693_s4 = inlined_call_operand.vmem [shape: f32[1,128], index: 4, kind: input, shape index: {}]   ;;  %s694_s5 = inlined_call_operand.vmem [shape: bf16[32,128], index: 5, kind: output, shape index: {}]  }
   0x1 LB: > { %s467_s19 = sadd.s32 4294967295, %s574_s18   ;;  %p471_p0 = scmp.ge.s32.totalorder %s574_s18, 1  ;;  %s574_s18 = sphi %s607_s18, %s15_s18  }
   0x2   : > { %p199_p1 = scmp.lt.s32.totalorder %s574_s18, 3 }
   0x4   : > { %p200_p2 = pnand %p471_p0, %p199_p1 }
   0x5   : > { %s472_s20 = sshll.u32 (!%p200_p2), %s467_s19, 1 }
   0x6   : > { %203 = sbr.rel (%p200_p2) target bundleno = 381 (0x17d), region = 40  ;;  %p233_p3 = scmp.lt.s32.totalorder (!%p200_p2), %s472_s20, 3 }
   0xb   : > { %v292_v0 = vld [vmem:[%s692_s3 + $0x78] sm:$0xff]  ;;  %v291_v1 = vld [vmem:[%s692_s3 + $0x70] sm:$0xff]  ;;  %v576_v2 = vmov 0   ;;  %v290_v3 = vld [vmem:[%s692_s3 + $0x68] sm:$0xff]  ;;  %s696_s20 = smov (!%p233_p3, %s472_s20), 3 }
   0xc   : > { %559 = vset.pattern.permute.xlu0 %v576_v2  ;;  %515 = vmatprep.subr.mxu0 %v292_v0  ;;  %v289_v4 = vld [vmem:[%s692_s3 + $0x60] sm:$0xff]  ;;  %s475_s29 = sshll.u32 %s696_s20, 3  ;;  %v288_v5 = vld [vmem:[%s692_s3 + $0x58] sm:$0xff]  ;;  %v287_v7 = vld [vmem:[%s692_s3 + $0x50] sm:$0xff]  ;;  %s473_s9 = sshll.u32 %s696_s20, 2 }
   0xd   : > { %516 = vmatpush3.msra.mxu0 %v292_v0  ;;  %s242_s7 = scalar_lea.vmem %s690_s1, %s475_s29  ;;  %v286_v9 = vld [vmem:[%s692_s3 + $0x48] sm:$0xff]  ;;  %v285_v10 = vld [vmem:[%s692_s3 + $0x40] sm:$0xff]  ;;  %v284_v11 = vld [vmem:[%s692_s3 + $0x38] sm:$0xff]  ;;  %s236_s12 = scalar_lea.vmem %s689_s0, %s473_s9 }
   0xe   : > { %517 = vmatprep.subr.mxu0 %v291_v1  ;;  %v254_v6 = vld [vmem:[%s242_s7] sm:$0xff]  ;;  %v255_v8 = vld [vmem:[%s242_s7 + $0x8] sm:$0xff]  ;;  %v283_v12 = vld [vmem:[%s692_s3 + $0x30] sm:$0xff]  ;;  %s248_s21 = scalar_lea.vmem %s694_s5, %s473_s9 }
   0xf   : > { %518 = vmatpush3.msra.mxu0 %v291_v1  ;;  %259 = vperm.xlu0 %559, %v254_v6   ;;  %v282_v13 = vld [vmem:[%s692_s3 + $0x28] sm:$0xff]  ;;  %v281_v14 = vld [vmem:[%s692_s3 + $0x20] sm:$0xff]  ;;  %v280_v15 = vld [vmem:[%s692_s3 + $0x18] sm:$0xff] }
  0x10   : > { %519 = vmatprep.subr.mxu0 %v290_v3  ;;  %v279_v16 = vld [vmem:[%s692_s3 + $0x10] sm:$0xff]  ;;  %v278_v17 = vld [vmem:[%s692_s3 + $0x8] sm:$0xff]  ;;  %v277_v18 = vld [vmem:[%s692_s3] sm:$0xff] }
  0x11   : > { %520 = vmatpush3.msra.mxu0 %v290_v3  ;;  %v489_v19 = vld [vmem:[%s236_s12] sm:$0xff]  }
  0x12   : > { %521 = vmatprep.subr.mxu0 %v289_v4  ;;  %v478_v20 = vld [vmem:[%s691_s2] ss:$0 sm:$0xff]  ;;  %v490_v21 = vunpack.c.l.bf16 %v489_v19  ;;  %v491_v24 = vunpack.c.h.bf16 %v489_v19 }
  0x13   : > { %522 = vmatpush3.msra.mxu0 %v289_v4  ;;  %264 = vperm.xlu0 %559, %v255_v8   ;;  %v479_v29 = vld [vmem:[%s693_s4] ss:$0 sm:$0xff] }
  0x14   : > { %523 = vmatprep.subr.mxu0 %v288_v5 }
  0x15   : > { %524 = vmatpush3.msra.mxu0 %v288_v5 }
  0x16   : > { %525 = vmatprep.subr.mxu0 %v287_v7 }
  0x17   : > { %526 = vmatpush3.msra.mxu0 %v287_v7 }
  0x18   : > { %527 = vmatprep.subr.mxu0 %v286_v9 }
  0x19   : > { %528 = vmatpush3.msra.mxu0 %v286_v9 }
  0x1a   : > { %529 = vmatprep.subr.mxu0 %v285_v10 }
  0x1b   : > { %530 = vmatpush3.msra.mxu0 %v285_v10 }
  0x1c   : > { %531 = vmatprep.subr.mxu0 %v284_v11 }
  0x1d   : > { %532 = vmatpush3.msra.mxu0 %v284_v11 }
  0x1e   : > { %533 = vmatprep.subr.mxu0 %v283_v12 }
  0x1f   : > { %534 = vmatpush3.msra.mxu0 %v283_v12 }
  0x20   : > { %535 = vmatprep.subr.mxu0 %v282_v13 }
  0x21   : > { %536 = vmatpush3.msra.mxu0 %v282_v13 }
  0x22   : > { %537 = vmatprep.subr.mxu0 %v281_v14 }
  0x23   : > { %538 = vmatpush3.msra.mxu0 %v281_v14 }
  0x24   : > { %539 = vmatprep.subr.mxu0 %v280_v15 }
  0x25   : > { %540 = vmatpush3.msra.mxu0 %v280_v15 }
  0x26   : > { %541 = vmatprep.subr.mxu0 %v279_v16 }
  0x27   : > { %542 = vmatpush3.msra.mxu0 %v279_v16 }
  0x28   : > { %543 = vmatprep.subr.mxu0 %v278_v17 }
  0x29   : > { %544 = vmatpush3.msra.mxu0 %v278_v17 }
  0x2a   : > { %545 = vmatprep.subr.mxu0 %v277_v18 }
  0x2b   : > { %546 = vmatpush3.msra.mxu0 %v277_v18 }
  0x8a   : > { %v260_v22 = vpop.permute.xlu0 %259 }
  0x8b   : > { %v273_v23 = vmul.f32 %v478_v20, %v260_v22 }
  0x8d   : > { %v275_v25 = vadd.f32 %v490_v21, %v273_v23 }
  0x8e   : > { %v265_v26 = vpop.permute.xlu0 %264 }
  0x8f   : > { %v274_v27 = vmul.f32 %v478_v20, %v265_v26  ;;  %547 = vmatprep.mubr.f32.mxu0 %v275_v25 }
  0x91   : > { %v276_v28 = vadd.f32 %v491_v24, %v274_v27 }
  0x93   : > { %548 = vmatmul.mubr.f32.vlgmr.msra.gmra.mxu0 %v276_v28 }
 0x153   : > { %v549_v30 = vpop.f32.mrf.mxu0 }
 0x154   : > { %v372_v31 = vadd.f32 %v549_v30, %v479_v29 }
 0x155   : > { %v366_v32 = vpop.f32.mrf.mxu0 }
 0x156   : > { %v481_v33 = vmul.f32 -1.442695, %v372_v31  ;;  %v367_v34 = vadd.f32 %v479_v29, %v366_v32 }
 0x158   : > { %560 = vpow2.f32 %v481_v33  ;;  %v480_v35 = vmul.f32 -1.442695, %v367_v34 }
 0x15a   : > { %562 = vpow2.f32 %v480_v35 }
 0x165   : > { %v561_v36 = vpop.eup %560 }
 0x166   : > { %v382_v37 = vadd.f32 1.0, %v561_v36 }
 0x167   : > { %v563_v38 = vpop.eup %562 }
 0x168   : > { %564 = vrcp.f32 %v382_v37  ;;  %v381_v39 = vadd.f32 1.0, %v563_v38 }
 0x16a   : > { %566 = vrcp.f32 %v381_v39 }
 0x175   : > { %v565_v40 = vpop.eup %564 }
 0x176   : > { %v388_v42 = vmul.f32 %v565_v40, %v372_v31 }
 0x177   : > { %v567_v41 = vpop.eup %566 }
 0x178   : > { %v387_v43 = vmul.f32 %v567_v41, %v367_v34 }
 0x17a   : > { %v495_v44 = vpack.c.bf16 %v388_v42, %v387_v43 }
 0x17c   : > { %496 = vst [vmem:[%s248_s21] sm:$0xff] %v495_v44  }
 0x17d PF: > { %s15_s18 = sadd.s32 1, %s574_s18  }
 0x17e   : > { %p12_p4 = scmp.ge.s32.totalorder %s15_s18, 4  }
 0x180   :  { %14 = sbr.rel (!%p12_p4) target bundleno = 1 (0x1), region = 73 }

</bundles_post_ra>
